<compile_context>
chip_gen: v6e
topology: v6e:2x2x1
jax: 0.10.0
libtpu: 0.0.40
codegen_flags: <defaults>
</compile_context>

<pallas_src>
import math

import jax
import jax.numpy as jnp
from jax.experimental import pallas as pl
from jax.experimental.pallas import tpu as pltpu

_DEFAULT_TILE_BYTES = 4 * 1024 * 1024  # per input/output buffer (double-buffered)


def _sine_kernel(w0_ref, x_ref, o_ref):
    # w0 lives in SMEM; elementwise scale + sin on the whole VMEM tile.
    # TODO(synk): if a bundle dump shows the VALU slot saturated (most likely
    # bf16 inputs on v6e/v7x), replace jnp.sin with a Cody-Waite range
    # reduction + low-degree minimax polynomial; kept generic here since
    # |w0*x| is unbounded for arbitrary SIREN pre-activations.
    w0 = w0_ref[0]
    xv = x_ref[...].astype(jnp.float32)
    o_ref[...] = jnp.sin(w0 * xv).astype(o_ref.dtype)


def _pick_lane_width(total: int, last_dim: int):
    """Largest lane-dense width that divides `total`. Returns (W, needs_pad)."""
    candidates = {512, 256, 128}
    if last_dim > 0 and last_dim % 128 == 0 and last_dim <= 2048:
        candidates.add(last_dim)
    for w in sorted(candidates, reverse=True):
        if total % w == 0:
            return w, False
    return 128, True  # misaligned total: fall back to a small pad


def sine(x: jax.Array, w0: float = 1.0, *, tile_bytes: int = _DEFAULT_TILE_BYTES) -> jax.Array:
    """Applies out = sin(w0 * x) elementwise via a Pallas TPU kernel."""
    orig_shape = x.shape
    orig_dtype = x.dtype
    total = math.prod(orig_shape) if orig_shape else 1

    if total == 0:  # empty tensor: nothing to compute
        return x

    last_dim = orig_shape[-1] if orig_shape else 1
    W, needs_pad = _pick_lane_width(total, last_dim)
    itemsize = jnp.dtype(orig_dtype).itemsize

    flat = x.reshape(-1)
    if needs_pad:
        padded_total = pl.cdiv(total, W) * W
        flat = jnp.pad(flat, (0, padded_total - total))  # rare path; tiny pad
    else:
        padded_total = total

    rows = padded_total // W
    x2 = flat.reshape(rows, W)  # bitcast-style reshape, no HBM copy

    # Largest row-tile keeping each buffer ~tile_bytes (multiple of 8 rows).
    max_block_rows = max(8, (tile_bytes // (W * itemsize)) // 8 * 8)
    if rows <= max_block_rows:
        block_rows = rows  # single full-extent block (exempt from 8-alignment)
    else:
        block_rows = max_block_rows  # multiple of 8; Pallas masks the ragged tail

    grid = (pl.cdiv(rows, block_rows),)

    # in + out, double-buffered, plus headroom. Safe on v5e/v6e/v7x.
    buf_bytes = block_rows * W * itemsize
    vmem_limit = int(max(4 * buf_bytes + (4 << 20), 16 << 20))

    w0_arr = jnp.asarray([w0], dtype=jnp.float32)

    out = pl.pallas_call(
        _sine_kernel,
        out_shape=jax.ShapeDtypeStruct((rows, W), orig_dtype),
        grid_spec=pltpu.PrefetchScalarGridSpec(
            num_scalar_prefetch=0,
            grid=grid,
            in_specs=[
                pl.BlockSpec(memory_space=pltpu.MemorySpace.SMEM),   # w0 scalar
                pl.BlockSpec((block_rows, W), lambda i: (i, 0)),     # x tile
            ],
            out_specs=pl.BlockSpec((block_rows, W), lambda i: (i, 0)),
        ),
        compiler_params=pltpu.CompilerParams(
            dimension_semantics=("parallel",),   # shards blocks across TCs on v7x
            vmem_limit_bytes=vmem_limit,
        ),
        cost_estimate=pl.CostEstimate(
            flops=padded_total,
            transcendentals=padded_total,
            bytes_accessed=2 * padded_total * itemsize,
        ),
    )(w0_arr, x2)

    if needs_pad:
        out = out.reshape(-1)[:total]
    return out.reshape(orig_shape)


if __name__ == "__main__":
    key = jax.random.PRNGKey(0)
    w0 = 30.0  # typical SIREN omega_0

    # Aligned case: total % 512 == 0 -> no wrapper pad/slice at all.
    x1 = jax.random.normal(key, (2, 8, 32), dtype=jnp.float32)
    y1 = jax.block_until_ready(sine(x1, w0=w0))
    assert y1.shape == x1.shape and y1.dtype == x1.dtype
    assert jnp.allclose(y1, jnp.sin(w0 * x1), atol=1e-4, rtol=1e-5)

    # Misaligned case (total % 128 != 0): exercises the small-pad fallback.
    x2 = jax.random.normal(jax.random.PRNGKey(1), (4, 3, 50), dtype=jnp.float32)
    y2 = jax.block_until_ready(sine(x2, w0=w0))
    assert y2.shape == x2.shape and y2.dtype == x2.dtype
    assert jnp.allclose(y2, jnp.sin(w0 * x2), atol=1e-4, rtol=1e-5)

    # bf16 input; lane width taken from the (multiple-of-128) last dim.
    x3 = jax.random.normal(jax.random.PRNGKey(2), (8, 256), dtype=jnp.bfloat16)
    y3 = jax.block_until_ready(sine(x3, w0=w0))
    assert y3.shape == x3.shape and y3.dtype == jnp.bfloat16
    ref3 = jnp.sin(w0 * x3.astype(jnp.float32))
    assert jnp.allclose(y3.astype(jnp.float32), ref3, atol=2e-2, rtol=2e-2)

    # Multi-block grid with a ragged last block (tiny tile override to force it).
    x4 = jax.random.normal(jax.random.PRNGKey(3), (48, 200), dtype=jnp.float32)
    y4 = jax.block_until_ready(sine(x4, w0=w0, tile_bytes=16 * 1024))
    assert y4.shape == x4.shape and y4.dtype == x4.dtype
    assert jnp.allclose(y4, jnp.sin(w0 * x4), atol=1e-4, rtol=1e-5)

    print("KERNEL_OK")
</pallas_src>

<mosaic_0001>
module attributes {stable_mosaic.version = 11 : i64} {
  func.func @_sine_kernel(%arg0: i32, %arg1: memref<1xf32, #tpu.memory_space<smem>>, %arg2: memref<1x512xf32, #tpu.memory_space<vmem>>, %arg3: memref<1x512xf32, #tpu.memory_space<vmem>>) attributes {dimension_semantics = [#tpu.dimension_semantics<parallel>], iteration_bounds = array<i64: 1>, scalar_prefetch = 0 : i64, scratch_operands = 0 : i64, tpu.core_type = #tpu.core_type<tc>, window_params = [{transform_indices = @transform_0, window_bounds = array<i64: 1>}, {transform_indices = @transform_1, window_bounds = array<i64: 1, 512>}, {transform_indices = @transform_2, window_bounds = array<i64: 1, 512>}]} {
    %c0 = arith.constant 0 : index
    %0 = memref.load %arg1[%c0] : memref<1xf32, #tpu.memory_space<smem>>
    %c0_0 = arith.constant 0 : index
    %c0_1 = arith.constant 0 : index
    %1 = vector.load %arg2[%c0_0, %c0_1] : memref<1x512xf32, #tpu.memory_space<vmem>>, vector<1x512xf32>
    %2 = vector.broadcast %0 : f32 to vector<1x512xf32>
    %3 = arith.mulf %2, %1 : vector<1x512xf32>
    %4 = math.sin %3 : vector<1x512xf32>
    %c0_2 = arith.constant 0 : index
    %c0_3 = arith.constant 0 : index
    %5 = vector.load %arg3[%c0_2, %c0_3] : memref<1x512xf32, #tpu.memory_space<vmem>>, vector<1x512xf32>
    tpu.vector_store %arg3[%c0_2, %c0_3], %4 {strides = array<i32>} : memref<1x512xf32, #tpu.memory_space<vmem>>, vector<1x512xf32>,
    return
  }
  func.func @transform_0(%arg0: i32) -> i32 {
    %c0_i32 = arith.constant 0 : i32
    %c0_i32_0 = arith.constant 0 : i32
    return %c0_i32 : i32
  }
  func.func @transform_1(%arg0: i32) -> (i32, i32) {
    %c0_i32 = arith.constant 0 : i32
    %c0_i32_0 = arith.constant 0 : i32
    return %arg0, %c0_i32 : i32, i32
  }
  func.func @transform_2(%arg0: i32) -> (i32, i32) {
    %c0_i32 = arith.constant 0 : i32
    %c0_i32_0 = arith.constant 0 : i32
    return %arg0, %c0_i32 : i32, i32
  }
}

</mosaic_0001>

<bundles_post_ra>
// kernel: tpu_custom_call.1
= control target key start
LH: loop header
LB: loop body
LE: loop exit
PB: predicated region body
PF: predicated region fallthrough
CT: control target
= control target key end

     0   :  { %8 = vsyncpa [#allocation4], 0  ;;  %s270_s0 = inlined_call_operand.<no memory space> [shape: f32[1], index: 0, kind: input, shape index: {}]   ;;  %s271_s1 = inlined_call_operand.hbm [shape: f32[1,512], index: 1, kind: input, shape index: {}]   ;;  %s272_s2 = inlined_call_operand.hbm [shape: f32[1,512], index: 2, kind: output, shape index: {}]  }
   0x1   :  { %9 = vsyncpa [#allocation5], 0  ;;  %s217_s9 = smov [#allocation3]  }
   0x2   :  { %s18_s10 = sshll.u32 %s217_s9, 4  ;;  %s19_s10 = int_to_ptr.vmem [resolvable:$true] %s18_s10 }
   0x3   :  { %s181_s11 = scalar_lea.vmem %s19_s10, 64  ;;  %p186_p1 = scmp.lt.s32.totalorder %s19_s10, %s19_s10 }
   0x4   :  { %p182_p0 = scmp.ne.s32.totalorder %s19_s10, %s181_s11  ;;  %p187_p2 = scmp.lt.s32.totalorder %s181_s11, %s181_s11 }
   0x6   :  { %p188_p3 = por %p187_p2, %p186_p1 }
   0x8   :  { %p189_p4 = pnand %p188_p3, %p182_p0 }
   0xa   :  { %192 = shalt.err (!%p189_p4)
}
   0xb   :  { %21 = dma.hbm_to_vmem [thread:$0]  %s271_s1, 64, %s19_s10, [#allocation4]  }
   0xc   :  { %213 = dma.done.wait [#allocation4], 64  }
   0xd   :  { %214 = vsyncadd [#allocation4], 4294967232  ;;  %v27_v0 = vstv %s270_s0  ;;  %v26_v1 = vld [vmem:[#allocation3] sm:$0xf]  ;;  %v218_v14 = vmov 683565275  }
   0xe   :  { %v246_v2 = vmul.f32 %v27_v0, %v26_v1  ;;  %v219_v16 = vmov 2475754826   ;;  %v220_v18 = vmov 2131351028   ;;  %v221_v20 = vmov 2102212464  }
   0xf   :  { %v222_v22 = vmov 920167782   ;;  %v223_v29 = vmov 1326507024   ;;  %s224_s0 = smov [#allocation6]  }
  0x10   :  { %v32_v3 = vand.u32 2139095040, %v246_v2  ;;  %v29_v5 = vand.u32 2147483647, %v246_v2  ;;  %vm31_vm7 = vcmp.lt.s32.totalorder %v246_v2, 0  ;;  %s144_s1 = sshll.u32 %s224_s0, 4  ;;  %vm121_vm12 = vweird.f32 %v246_v2  ;;  %s145_s1 = int_to_ptr.vmem [resolvable:$true] %s144_s1 }
  0x11   :  { %s193_s16 = scalar_lea.vmem %s145_s1, 64  ;;  %p198_p6 = scmp.lt.s32.totalorder %s145_s1, %s145_s1 }
  0x12   :  { %v33_v4 = vshrl.u32 %v32_v3, 23  ;;  %v36_v8 = vand.u32 8388607, %v29_v5  ;;  %vm30_vm8 = vcmp.le.f32.partialorder %v29_v5, 0.7853982  ;;  %p194_p5 = scmp.ne.s32.totalorder %s145_s1, %s193_s16  ;;  %p199_p7 = scmp.lt.s32.totalorder %s193_s16, %s193_s16 }
  0x14   :  { %v153_v6 = vadd.s32 4294967169, %v33_v4  ;;  %v37_v11 = vor.u32 8388608, %v36_v8  ;;  %p200_p8 = por %p199_p7, %p198_p6 }
  0x16   :  { %v39_v7 = vadd.s32 1, %v153_v6  ;;  %v77_v31 = vshll.u32 %v37_v11, 8  ;;  %p201_p9 = pnand %p200_p8, %p194_p5 }
  0x18   :  { %vm40_vm0 = vcmp.gt.s32.totalorder %v39_v7, 0 }
  0x19   :  { %v41_v9 = vsel %vm40_vm0, %v39_v7, 0 }
  0x1a   :  { %v43_v10 = vand.u32 31, %v41_v9  ;;  %v42_v12 = vshrl.u32 %v41_v9, 5 }
  0x1c   :  { %v44_v13 = vsub.s32 32, %v43_v10  ;;  %v46_v15 = vshll.u32 %v218_v14, %v43_v10  ;;  %v49_v17 = vshll.u32 %v219_v16, %v43_v10  ;;  %v52_v19 = vshll.u32 %v220_v18, %v43_v10 }
  0x1d   :  { %v55_v21 = vshll.u32 %v221_v20, %v43_v10  ;;  %v58_v23 = vshll.u32 %v222_v22, %v43_v10  ;;  %vm61_vm1 = vcmp.lt.s32.totalorder %v42_v12, 1  ;;  %vm64_vm2 = vcmp.lt.s32.totalorder %v42_v12, 4 }
  0x1e   :  { %v45_v24 = vshrl.u32 %v218_v14, %v44_v13  ;;  %v47_v25 = vshrl.u32 %v219_v16, %v44_v13  ;;  %v50_v26 = vshrl.u32 %v220_v18, %v44_v13  ;;  %v53_v27 = vshrl.u32 %v221_v20, %v44_v13 }
  0x1f   :  { %v56_v28 = vshrl.u32 %v222_v22, %v44_v13  ;;  %v59_v30 = vshrl.u32 %v223_v29, %v44_v13  ;;  %vm62_vm3 = vcmp.lt.s32.totalorder %v42_v12, 2  ;;  %vm63_vm4 = vcmp.lt.s32.totalorder %v42_v12, 3 }
  0x20   :  { %v48_v32 = vor.u32 %v47_v25, %v46_v15  ;;  %v51_v33 = vor.u32 %v50_v26, %v49_v17  ;;  %v54_v34 = vor.u32 %v53_v27, %v52_v19  ;;  %v133_v25 = vlaneseq }
  0x21   :  { %v57_v35 = vor.u32 %v56_v28, %v55_v21  ;;  %v60_v36 = vor.u32 %v59_v30, %v58_v23 }
  0x22   :  { %v65_v37 = vsel %vm61_vm1, %v45_v24, %v48_v32  ;;  %v66_v38 = vsel %vm64_vm2, %v54_v34, 2102212464  ;;  %v69_v39 = vsel %vm61_vm1, %v48_v32, %v51_v33  ;;  %v73_v40 = vsel %vm61_vm1, %v51_v33, %v54_v34 }
  0x23   :  { %v67_v41 = vsel %vm63_vm4, %v51_v33, %v66_v38  ;;  %v70_v42 = vsel %vm64_vm2, %v57_v35, 920167782  ;;  %v74_v43 = vsel %vm64_vm2, %v60_v36, 1326507024  ;;  %vm135_vm13 = vcmp.lt.s32.totalorder %v133_v25, 512 }
  0x24   :  { %v71_v44 = vsel %vm63_vm4, %v54_v34, %v70_v42  ;;  %v75_v45 = vsel %vm63_vm4, %v57_v35, %v74_v43  ;;  %v68_v46 = vsel %vm62_vm3, %v65_v37, %v67_v41 }
  0x25   :  { %v72_v47 = vsel %vm62_vm3, %v69_v39, %v71_v44  ;;  %v76_v48 = vsel %vm62_vm3, %v73_v40, %v75_v45  ;;  %v84_v53 = vmul.u32 %v77_v31, %v68_v46 }
  0x26   :  { %v252_v49 = vmul.u32.u64.low %v77_v31, %v76_v48  ;;  %v253_v50 = vmul.u32.u64.high %v77_v31, %v76_v48, %v252_v49  ;;  %v255_v51 = vmul.u32.u64.low %v77_v31, %v72_v47  ;;  %v256_v52 = vmul.u32.u64.high %v77_v31, %v72_v47, %v255_v51 }
  0x28   :  { %vm86_vm5 = vc.u32 %v253_v50, %v255_v51  ;;  %v87_v54 = vadd.s32 1, %v256_v52  ;;  %v85_v1 = vadd.s32 %v255_v51, %v253_v50 }
  0x2a   :  { %v88_v55 = vsel %vm86_vm5, %v87_v54, %v256_v52 }
  0x2b   :  { %v89_v56 = vadd.s32 %v88_v55, %v84_v53 }
  0x2d   :  { %v90_v57 = vadd.s32 536870912, %v89_v56 }
  0x2f   :  { %v91_v58 = vshrl.u32 %v90_v57, 30 }
  0x31   :  { %v92_v59 = vshll.u32 %v91_v58, 30  ;;  %v115_v16 = vsub.s32 4, %v91_v58 }
  0x33   :  { %v93_v60 = vsub.s32 %v89_v56, %v92_v59  ;;  %v116_v19 = vsel %vm31_vm7, %v115_v16, %v91_v58 }
  0x34   :  { %v118_v21 = vsel %vm30_vm8, 0, %v116_v19 }
  0x35   :  { %v95_v61 = vsub.s32 0, %v93_v60  ;;  %v122_v22 = vadd.s32 3, %v118_v21 }
  0x37   :  { %v154_v62 = vmin.u32 %v95_v61, %v93_v60  ;;  %v123_v23 = vand.u32 3, %v122_v22 }
  0x39   :  { %v97_v63 = vclz %v154_v62  ;;  %vm128_vm9 = vcmp.eq.s32.totalorder %v123_v23, 2  ;;  %vm125_vm10 = vcmp.eq.s32.totalorder %v123_v23, 0  ;;  %vm124_vm11 = vcmp.lt.s32.totalorder %v123_v23, 2 }
  0x3b   :  { %v155_v0 = vadd.s32 4294967294, %v97_v63 }
  0x3d   :  { %vm156_vm6 = vcmp.lt.s32.totalorder %v155_v0, 0 }
  0x3e   :  { %v100_v3 = vsel %vm156_vm6, 0, %v155_v0 }
  0x3f   :  { %v101_v4 = vsub.s32 32, %v100_v3  ;;  %v102_v6 = vshll.u32 %v93_v60, %v100_v3  ;;  %v105_v7 = vsub.s32 4294967266, %v100_v3 }
  0x41   :  { %v103_v8 = vshrl.u32 %v85_v1, %v101_v4  ;;  %v106_v9 = vadd.s32 127, %v105_v7 }
  0x43   :  { %v104_v10 = vor.u32 %v103_v8, %v102_v6  ;;  %v107_v11 = vshll.u32 %v106_v9, 23 }
  0x45   :  { %v108_v12 = vor.u32 4788187, %v107_v11  ;;  %v111_v13 = vcvt.s32.f32 %v104_v10 }
  0x47   :  { %v109_v14 = vand.u32 2147483647, %v108_v12 }
  0x49   :  { %v112_v15 = vmul.f32 %v111_v13, %v109_v14 }
  0x4b   :  { %v113_v17 = vxor.u32 2147483648, %v112_v15 }
  0x4d   :  { %v114_v18 = vsel %vm31_vm7, %v113_v17, %v112_v15 }
  0x4e   :  { %v117_v20 = vsel %vm30_vm8, %v246_v2, %v114_v18 }
  0x4f   :  { %169 = vcosq.f32 %v117_v20 }
  0x50   :  { %171 = vsinq.f32 %v117_v20 }
  0x5c   :  { %v170_v24 = vpop.eup %169 }
  0x5d   :  { %v172_v26 = vpop.eup %171  ;;  %v129_v27 = vxor.u32 2147483648, %v170_v24 }
  0x5e   :  { %v126_v28 = vxor.u32 2147483648, %v172_v26 }
  0x5f   :  { %v130_v5 = vsel %vm128_vm9, %v129_v27, %v172_v26 }
  0x60   :  { %v127_v29 = vsel %vm125_vm10, %v170_v24, %v126_v28 }
  0x61   :  { %v131_v30 = vsel %vm124_vm11, %v127_v29, %v130_v5 }
  0x62   :  { %v132_v31 = vsel %vm121_vm12, nan, %v131_v30 }
  0x63   :  { %137 = vst.msk [vmem:[#allocation6] sm:$0xf] %vm135_vm13, %v132_v31 }
  0x64   :  { %204 = shalt.err (!%p201_p9)
}
  0x65   :  { %147 = dma.vmem_to_hbm [thread:$0]  %s145_s1, 64, %s272_s2, [#allocation5]  }
  0x66   :  { %215 = dma.done.wait [#allocation5], 64  }
  0x67   :  { %216 = vsyncadd [#allocation5], 4294967232 }
  0x68   :  { %151 = vsyncpa [#allocation4], 1 }
  0x69   :  { %152 = vsyncpa [#allocation5], 1 }

</bundles_post_ra>
